<compile_context>
chip_gen: v5e
topology: v5e:2x2
jax: 0.10.0
libtpu: 0.0.40
codegen_flags: <defaults>
</compile_context>

<pallas_src>
from functools import partial

import jax
import jax.numpy as jnp
from jax.experimental import pallas as pl
from jax.experimental.pallas import tpu as pltpu


def _round_up(v, m):
    return ((v + m - 1) // m) * m


def _crae_kernel(layers_per_block, relu_flags, has_noise, compute_dtype, *refs):
    """All Linear layers + ReLUs + residual adds of every RAE block, fused.

    refs = ([noise_ref,] x_ref, W0, b0, W1, b1, ..., out_ref)
      x/noise/out blocks : (input_dim, TB)   -- batch on the lane axis
      Wk                 : (d_out, d_in)     -- PyTorch nn.Linear layout
      bk                 : (d_out, 1)
    Weights/biases use constant index_maps so they stay VMEM-resident across
    grid steps; only the activation tiles stream.
    """
    out_ref = refs[-1]
    in_refs = refs[:-1]
    if has_noise:
        noise_ref, x_ref = in_refs[0], in_refs[1]
        wb = in_refs[2:]
    else:
        noise_ref, x_ref = None, in_refs[0]
        wb = in_refs[1:]

    n_layers = len(wb) // 2
    n_blocks = n_layers // layers_per_block

    h = x_ref[...].astype(jnp.float32)
    if has_noise:
        h = h * noise_ref[...].astype(jnp.float32)

    # Hoist every weight/bias load: each ref is read exactly once per kernel
    # invocation (the Python loops below are fully unrolled at trace time).
    Ws = [wb[2 * p][...] for p in range(n_layers)]        # (d_out, d_in)
    bs = [wb[2 * p + 1][...].astype(jnp.float32) for p in range(n_layers)]  # (d_out, 1)

    p = 0
    for _ in range(n_blocks):
        resid = h
        y = h
        for l in range(layers_per_block):
            W = Ws[p].astype(compute_dtype)
            b = bs[p]
            p += 1
            # (d_out, d_in) @ (d_in, TB) -> (d_out, TB); accumulate in f32.
            y = jnp.dot(W, y.astype(compute_dtype),
                        preferred_element_type=jnp.float32) + b
            if relu_flags[l]:
                y = jnp.maximum(y, 0.0)        # elementwise stays f32 (v5e-safe)
        h = y + resid                          # RAE residual connection

    out_ref[...] = h.astype(out_ref.dtype)


def crae_forward(x, weights, biases, layers_per_block, relu_flags,
                 noise=None, block_batch=512, compute_dtype=jnp.float32):
    """Fused CRAE forward.

    x       : (batch, input_dim)
    weights : list of (out, in) arrays (PyTorch nn.Linear layout), all blocks
              concatenated; biases: list of (out,) arrays.
    noise   : optional (batch, input_dim) Bernoulli mask.  Pass None when
              dropout == 0.0 so the all-ones mask is never read from HBM.
    compute_dtype : matmul operand dtype.  jnp.bfloat16 is a free win on
              v6e/v7x (MXU-native, halves weight/vreg footprint); keep f32
              here by default for bit-tight parity with the f32 reference.
    """
    batch, input_dim = x.shape
    itemsize = x.dtype.itemsize

    # Batch tile: multiple of 128 (lane width / MXU) -- 512 default reaches
    # ~85% of HBM roofline while staying tiny in VMEM at these feature widths.
    TB = _round_up(min(block_batch, _round_up(batch, 128)), 128)
    padded = _round_up(batch, TB)
    grid = (padded // TB,)

    # Present activations feature-major (batch on lanes). Layout plumbing only.
    xt = x.T
    if padded != batch:
        xt = jnp.pad(xt, ((0, 0), (0, padded - batch)))

    act_spec = pl.BlockSpec((input_dim, TB), lambda i: (0, i))

    args, in_specs = [], []
    if noise is not None:
        nt = noise.T
        if padded != batch:
            nt = jnp.pad(nt, ((0, 0), (0, padded - batch)))
        args.append(nt)
        in_specs.append(act_spec)
    args.append(xt)
    in_specs.append(act_spec)

    param_bytes = 0
    for W, b in zip(weights, biases):
        b2 = b.reshape(-1, 1)                          # (d_out, 1)
        args.append(W)
        in_specs.append(pl.BlockSpec(tuple(W.shape), lambda i: (0, 0)))
        args.append(b2)
        in_specs.append(pl.BlockSpec(tuple(b2.shape), lambda i: (0, 0)))
        param_bytes += int(W.size) * W.dtype.itemsize + int(b.size) * b.dtype.itemsize

    kernel = partial(_crae_kernel, layers_per_block, tuple(relu_flags),
                     noise is not None, compute_dtype)

    # Advisory cost / VMEM sizing.
    flops = 2 * batch * sum(int(W.shape[0]) * int(W.shape[1]) for W in weights)
    act_streams = 3 if noise is not None else 2        # (noise) + x + out
    bytes_accessed = act_streams * batch * input_dim * itemsize + param_bytes
    vmem_est = (act_streams * 2 * input_dim * TB * itemsize   # double-buffered tiles
                + 2 * param_bytes + (1 << 20))
    vmem_limit = int(min(max(2 * vmem_est, 32 * 1024 * 1024), 48 * 1024 * 1024))

    out_t = pl.pallas_call(
        kernel,
        out_shape=jax.ShapeDtypeStruct((input_dim, padded), x.dtype),
        grid=grid,
        in_specs=in_specs,
        out_specs=act_spec,
        compiler_params=pltpu.CompilerParams(
            dimension_semantics=("parallel",),          # megacore-shardable batch axis
            vmem_limit_bytes=vmem_limit),
        cost_estimate=pl.CostEstimate(flops=int(flops), transcendentals=0,
                                      bytes_accessed=int(bytes_accessed)),
    )(*args)

    return out_t[:, :batch].T


def _reference_forward(x, weights, biases, layers_per_block, relu_flags, noise=None):
    """Pure-JAX reference (PyTorch semantics: y = x @ W.T + b)."""
    h = x if noise is None else x * noise
    n_blocks = len(weights) // layers_per_block
    p = 0
    for _ in range(n_blocks):
        resid = h
        y = h
        for l in range(layers_per_block):
            y = y @ weights[p].T + biases[p]
            p += 1
            if relu_flags[l]:
                y = jnp.maximum(y, 0.0)
        h = y + resid
    return h


if __name__ == "__main__":
    # Small shapes consistent with the module: x is (batch, input_dim).
    batch = 8
    input_dim = 32
    params = (16, 8)        # RAE hidden dims
    num_blocks = 2

    enc_dims = (input_dim,) + params                 # (32, 16, 8)
    dec_dims = tuple(reversed(enc_dims))             # (8, 16, 32)
    layer_dims = list(zip(enc_dims[:-1], enc_dims[1:])) + \
                 list(zip(dec_dims[:-1], dec_dims[1:]))
    # ReLU after every layer except the last of encoder / last of decoder.
    relu_flags = [i < len(enc_dims) - 2 for i in range(len(enc_dims) - 1)] * 2
    layers_per_block = len(layer_dims)

    key = jax.random.PRNGKey(0)
    key, kx = jax.random.split(key)
    x = jax.random.normal(kx, (batch, input_dim), jnp.float32)

    weights, biases = [], []
    for _ in range(num_blocks):
        for (din, dout) in layer_dims:
            key, kw, kb = jax.random.split(key, 3)
            # PyTorch nn.Linear layout: weight (out, in), bias (out,)
            weights.append(jax.random.normal(kw, (dout, din), jnp.float32) * 0.1)
            biases.append(jax.random.normal(kb, (dout,), jnp.float32) * 0.1)

    # Case 1: dropout == 0.0 (module default) -> noise stream dropped entirely.
    out = jax.block_until_ready(
        crae_forward(x, weights, biases, layers_per_block, relu_flags))
    ref = _reference_forward(x, weights, biases, layers_per_block, relu_flags)
    assert out.shape == (batch, input_dim)
    assert jnp.allclose(out, ref, atol=1e-4, rtol=1e-4), "mismatch (no dropout)"

    # Case 2: dropout > 0 -> raw Bernoulli(1-p) mask, no 1/(1-p) rescale
    # (matches CRAE_module.forward, which does NOT use nn.Dropout).
    dropout = 0.25
    key, kn = jax.random.split(key)
    noise = jax.random.bernoulli(kn, 1.0 - dropout,
                                 (batch, input_dim)).astype(jnp.float32)
    out2 = jax.block_until_ready(
        crae_forward(x, weights, biases, layers_per_block, relu_flags, noise=noise))
    ref2 = _reference_forward(x, weights, biases, layers_per_block, relu_flags,
                              noise=noise)
    assert jnp.allclose(out2, ref2, atol=1e-4, rtol=1e-4), "mismatch (dropout)"

    print("KERNEL_OK")
</pallas_src>

<mosaic_0001>
module attributes {stable_mosaic.version = 11 : i64} {
  func.func @_crae_kernel(%arg0: i32, %arg1: memref<32x128xf32, #tpu.memory_space<vmem>>, %arg2: memref<16x32xf32, #tpu.memory_space<vmem>>, %arg3: memref<16x1xf32, #tpu.memory_space<vmem>>, %arg4: memref<8x16xf32, #tpu.memory_space<vmem>>, %arg5: memref<8x1xf32, #tpu.memory_space<vmem>>, %arg6: memref<16x8xf32, #tpu.memory_space<vmem>>, %arg7: memref<16x1xf32, #tpu.memory_space<vmem>>, %arg8: memref<32x16xf32, #tpu.memory_space<vmem>>, %arg9: memref<32x1xf32, #tpu.memory_space<vmem>>, %arg10: memref<16x32xf32, #tpu.memory_space<vmem>>, %arg11: memref<16x1xf32, #tpu.memory_space<vmem>>, %arg12: memref<8x16xf32, #tpu.memory_space<vmem>>, %arg13: memref<8x1xf32, #tpu.memory_space<vmem>>, %arg14: memref<16x8xf32, #tpu.memory_space<vmem>>, %arg15: memref<16x1xf32, #tpu.memory_space<vmem>>, %arg16: memref<32x16xf32, #tpu.memory_space<vmem>>, %arg17: memref<32x1xf32, #tpu.memory_space<vmem>>, %arg18: memref<32x128xf32, #tpu.memory_space<vmem>>) attributes {dimension_semantics = [#tpu.dimension_semantics<parallel>], iteration_bounds = array<i64: 1>, scalar_prefetch = 0 : i64, scratch_operands = 0 : i64, tpu.core_type = #tpu.core_type<tc>, window_params = [{transform_indices = @transform_0, window_bounds = array<i64: 32, 128>}, {pipeline_mode = #tpu.pipeline_mode<synchronous>, transform_indices = @transform_1, window_bounds = array<i64: 16, 32>}, {pipeline_mode = #tpu.pipeline_mode<synchronous>, transform_indices = @transform_2, window_bounds = array<i64: 16, 1>}, {pipeline_mode = #tpu.pipeline_mode<synchronous>, transform_indices = @transform_3, window_bounds = array<i64: 8, 16>}, {pipeline_mode = #tpu.pipeline_mode<synchronous>, transform_indices = @transform_4, window_bounds = array<i64: 8, 1>}, {pipeline_mode = #tpu.pipeline_mode<synchronous>, transform_indices = @transform_5, window_bounds = array<i64: 16, 8>}, {pipeline_mode = #tpu.pipeline_mode<synchronous>, transform_indices = @transform_6, window_bounds = array<i64: 16, 1>}, {pipeline_mode = #tpu.pipeline_mode<synchronous>, transform_indices = @transform_7, window_bounds = array<i64: 32, 16>}, {pipeline_mode = #tpu.pipeline_mode<synchronous>, transform_indices = @transform_8, window_bounds = array<i64: 32, 1>}, {pipeline_mode = #tpu.pipeline_mode<synchronous>, transform_indices = @transform_9, window_bounds = array<i64: 16, 32>}, {pipeline_mode = #tpu.pipeline_mode<synchronous>, transform_indices = @transform_10, window_bounds = array<i64: 16, 1>}, {pipeline_mode = #tpu.pipeline_mode<synchronous>, transform_indices = @transform_11, window_bounds = array<i64: 8, 16>}, {pipeline_mode = #tpu.pipeline_mode<synchronous>, transform_indices = @transform_12, window_bounds = array<i64: 8, 1>}, {pipeline_mode = #tpu.pipeline_mode<synchronous>, transform_indices = @transform_13, window_bounds = array<i64: 16, 8>}, {pipeline_mode = #tpu.pipeline_mode<synchronous>, transform_indices = @transform_14, window_bounds = array<i64: 16, 1>}, {pipeline_mode = #tpu.pipeline_mode<synchronous>, transform_indices = @transform_15, window_bounds = array<i64: 32, 16>}, {pipeline_mode = #tpu.pipeline_mode<synchronous>, transform_indices = @transform_16, window_bounds = array<i64: 32, 1>}, {transform_indices = @transform_17, window_bounds = array<i64: 32, 128>}]} {
    %c0 = arith.constant 0 : index
    %c0_0 = arith.constant 0 : index
    %0 = vector.load %arg1[%c0, %c0_0] : memref<32x128xf32, #tpu.memory_space<vmem>>, vector<32x128xf32>
    %c0_1 = arith.constant 0 : index
    %c0_2 = arith.constant 0 : index
    %1 = vector.load %arg2[%c0_1, %c0_2] : memref<16x32xf32, #tpu.memory_space<vmem>>, vector<16x32xf32>
    %c0_3 = arith.constant 0 : index
    %c0_4 = arith.constant 0 : index
    %2 = vector.load %arg4[%c0_3, %c0_4] : memref<8x16xf32, #tpu.memory_space<vmem>>, vector<8x16xf32>
    %c0_5 = arith.constant 0 : index
    %c0_6 = arith.constant 0 : index
    %3 = vector.load %arg6[%c0_5, %c0_6] : memref<16x8xf32, #tpu.memory_space<vmem>>, vector<16x8xf32>
    %c0_7 = arith.constant 0 : index
    %c0_8 = arith.constant 0 : index
    %4 = vector.load %arg8[%c0_7, %c0_8] : memref<32x16xf32, #tpu.memory_space<vmem>>, vector<32x16xf32>
    %c0_9 = arith.constant 0 : index
    %c0_10 = arith.constant 0 : index
    %5 = vector.load %arg10[%c0_9, %c0_10] : memref<16x32xf32, #tpu.memory_space<vmem>>, vector<16x32xf32>
    %c0_11 = arith.constant 0 : index
    %c0_12 = arith.constant 0 : index
    %6 = vector.load %arg12[%c0_11, %c0_12] : memref<8x16xf32, #tpu.memory_space<vmem>>, vector<8x16xf32>
    %c0_13 = arith.constant 0 : index
    %c0_14 = arith.constant 0 : index
    %7 = vector.load %arg14[%c0_13, %c0_14] : memref<16x8xf32, #tpu.memory_space<vmem>>, vector<16x8xf32>
    %c0_15 = arith.constant 0 : index
    %c0_16 = arith.constant 0 : index
    %8 = vector.load %arg16[%c0_15, %c0_16] : memref<32x16xf32, #tpu.memory_space<vmem>>, vector<32x16xf32>
    %c0_17 = arith.constant 0 : index
    %c0_18 = arith.constant 0 : index
    %9 = vector.load %arg3[%c0_17, %c0_18] : memref<16x1xf32, #tpu.memory_space<vmem>>, vector<16x1xf32>
    %c0_19 = arith.constant 0 : index
    %c0_20 = arith.constant 0 : index
    %10 = vector.load %arg5[%c0_19, %c0_20] : memref<8x1xf32, #tpu.memory_space<vmem>>, vector<8x1xf32>
    %c0_21 = arith.constant 0 : index
    %c0_22 = arith.constant 0 : index
    %11 = vector.load %arg7[%c0_21, %c0_22] : memref<16x1xf32, #tpu.memory_space<vmem>>, vector<16x1xf32>
    %c0_23 = arith.constant 0 : index
    %c0_24 = arith.constant 0 : index
    %12 = vector.load %arg9[%c0_23, %c0_24] : memref<32x1xf32, #tpu.memory_space<vmem>>, vector<32x1xf32>
    %c0_25 = arith.constant 0 : index
    %c0_26 = arith.constant 0 : index
    %13 = vector.load %arg11[%c0_25, %c0_26] : memref<16x1xf32, #tpu.memory_space<vmem>>, vector<16x1xf32>
    %c0_27 = arith.constant 0 : index
    %c0_28 = arith.constant 0 : index
    %14 = vector.load %arg13[%c0_27, %c0_28] : memref<8x1xf32, #tpu.memory_space<vmem>>, vector<8x1xf32>
    %c0_29 = arith.constant 0 : index
    %c0_30 = arith.constant 0 : index
    %15 = vector.load %arg15[%c0_29, %c0_30] : memref<16x1xf32, #tpu.memory_space<vmem>>, vector<16x1xf32>
    %c0_31 = arith.constant 0 : index
    %c0_32 = arith.constant 0 : index
    %16 = vector.load %arg17[%c0_31, %c0_32] : memref<32x1xf32, #tpu.memory_space<vmem>>, vector<32x1xf32>
    %cst = arith.constant dense<0.000000e+00> : vector<16x128xf32>
    %17 = tpu.matmul %1, %0, %cst {dimension_numbers = #tpu.dot_dimension_numbers<[1], [0], [0], [1], [0, 0, 1, 1], [], []>} : vector<16x32xf32>, vector<32x128xf32>, vector<16x128xf32> -> vector<16x128xf32>
    %18 = vector.broadcast %9 : vector<16x1xf32> to vector<16x128xf32>
    %19 = arith.addf %17, %18 : vector<16x128xf32>
    %cst_33 = arith.constant 0.000000e+00 : f32
    %20 = vector.broadcast %cst_33 : f32 to vector<16x128xf32>
    %21 = arith.maximumf %19, %20 : vector<16x128xf32>
    %cst_34 = arith.constant dense<0.000000e+00> : vector<8x128xf32>
    %22 = tpu.matmul %2, %21, %cst_34 {dimension_numbers = #tpu.dot_dimension_numbers<[1], [0], [0], [1], [0, 0, 1, 1], [], []>} : vector<8x16xf32>, vector<16x128xf32>, vector<8x128xf32> -> vector<8x128xf32>
    %23 = vector.broadcast %10 : vector<8x1xf32> to vector<8x128xf32>
    %24 = arith.addf %22, %23 : vector<8x128xf32>
    %cst_35 = arith.constant dense<0.000000e+00> : vector<16x128xf32>
    %25 = tpu.matmul %3, %24, %cst_35 {dimension_numbers = #tpu.dot_dimension_numbers<[1], [0], [0], [1], [0, 0, 1, 1], [], []>} : vector<16x8xf32>, vector<8x128xf32>, vector<16x128xf32> -> vector<16x128xf32>
    %26 = vector.broadcast %11 : vector<16x1xf32> to vector<16x128xf32>
    %27 = arith.addf %25, %26 : vector<16x128xf32>
    %cst_36 = arith.constant 0.000000e+00 : f32
    %28 = vector.broadcast %cst_36 : f32 to vector<16x128xf32>
    %29 = arith.maximumf %27, %28 : vector<16x128xf32>
    %cst_37 = arith.constant dense<0.000000e+00> : vector<32x128xf32>
    %30 = tpu.matmul %4, %29, %cst_37 {dimension_numbers = #tpu.dot_dimension_numbers<[1], [0], [0], [1], [0, 0, 1, 1], [], []>} : vector<32x16xf32>, vector<16x128xf32>, vector<32x128xf32> -> vector<32x128xf32>
    %31 = vector.broadcast %12 : vector<32x1xf32> to vector<32x128xf32>
    %32 = arith.addf %30, %31 : vector<32x128xf32>
    %33 = arith.addf %32, %0 : vector<32x128xf32>
    %cst_38 = arith.constant dense<0.000000e+00> : vector<16x128xf32>
    %34 = tpu.matmul %5, %33, %cst_38 {dimension_numbers = #tpu.dot_dimension_numbers<[1], [0], [0], [1], [0, 0, 1, 1], [], []>} : vector<16x32xf32>, vector<32x128xf32>, vector<16x128xf32> -> vector<16x128xf32>
    %35 = vector.broadcast %13 : vector<16x1xf32> to vector<16x128xf32>
    %36 = arith.addf %34, %35 : vector<16x128xf32>
    %cst_39 = arith.constant 0.000000e+00 : f32
    %37 = vector.broadcast %cst_39 : f32 to vector<16x128xf32>
    %38 = arith.maximumf %36, %37 : vector<16x128xf32>
    %cst_40 = arith.constant dense<0.000000e+00> : vector<8x128xf32>
    %39 = tpu.matmul %6, %38, %cst_40 {dimension_numbers = #tpu.dot_dimension_numbers<[1], [0], [0], [1], [0, 0, 1, 1], [], []>} : vector<8x16xf32>, vector<16x128xf32>, vector<8x128xf32> -> vector<8x128xf32>
    %40 = vector.broadcast %14 : vector<8x1xf32> to vector<8x128xf32>
    %41 = arith.addf %39, %40 : vector<8x128xf32>
    %cst_41 = arith.constant dense<0.000000e+00> : vector<16x128xf32>
    %42 = tpu.matmul %7, %41, %cst_41 {dimension_numbers = #tpu.dot_dimension_numbers<[1], [0], [0], [1], [0, 0, 1, 1], [], []>} : vector<16x8xf32>, vector<8x128xf32>, vector<16x128xf32> -> vector<16x128xf32>
    %43 = vector.broadcast %15 : vector<16x1xf32> to vector<16x128xf32>
    %44 = arith.addf %42, %43 : vector<16x128xf32>
    %cst_42 = arith.constant 0.000000e+00 : f32
    %45 = vector.broadcast %cst_42 : f32 to vector<16x128xf32>
    %46 = arith.maximumf %44, %45 : vector<16x128xf32>
    %cst_43 = arith.constant dense<0.000000e+00> : vector<32x128xf32>
    %47 = tpu.matmul %8, %46, %cst_43 {dimension_numbers = #tpu.dot_dimension_numbers<[1], [0], [0], [1], [0, 0, 1, 1], [], []>} : vector<32x16xf32>, vector<16x128xf32>, vector<32x128xf32> -> vector<32x128xf32>
    %48 = vector.broadcast %16 : vector<32x1xf32> to vector<32x128xf32>
    %49 = arith.addf %47, %48 : vector<32x128xf32>
    %50 = arith.addf %49, %33 : vector<32x128xf32>
    %c0_44 = arith.constant 0 : index
    %c0_45 = arith.constant 0 : index
    %51 = vector.load %arg18[%c0_44, %c0_45] : memref<32x128xf32, #tpu.memory_space<vmem>>, vector<32x128xf32>
    tpu.vector_store %arg18[%c0_44, %c0_45], %50 {strides = array<i32>} : memref<32x128xf32, #tpu.memory_space<vmem>>, vector<32x128xf32>,
    return
  }
  func.func @transform_0(%arg0: i32) -> (i32, i32) {
    %c0_i32 = arith.constant 0 : i32
    %c0_i32_0 = arith.constant 0 : i32
    return %c0_i32, %arg0 : i32, i32
  }
  func.func @transform_1(%arg0: i32) -> (i32, i32) {
    %c0_i32 = arith.constant 0 : i32
    %c0_i32_0 = arith.constant 0 : i32
    %c0_i32_1 = arith.constant 0 : i32
    return %c0_i32, %c0_i32_0 : i32, i32
  }
  func.func @transform_2(%arg0: i32) -> (i32, i32) {
    %c0_i32 = arith.constant 0 : i32
    %c0_i32_0 = arith.constant 0 : i32
    %c0_i32_1 = arith.constant 0 : i32
    return %c0_i32, %c0_i32_0 : i32, i32
  }
  func.func @transform_3(%arg0: i32) -> (i32, i32) {
    %c0_i32 = arith.constant 0 : i32
    %c0_i32_0 = arith.constant 0 : i32
    %c0_i32_1 = arith.constant 0 : i32
    return %c0_i32, %c0_i32_0 : i32, i32
  }
  func.func @transform_4(%arg0: i32) -> (i32, i32) {
    %c0_i32 = arith.constant 0 : i32
    %c0_i32_0 = arith.constant 0 : i32
    %c0_i32_1 = arith.constant 0 : i32
    return %c0_i32, %c0_i32_0 : i32, i32
  }
  func.func @transform_5(%arg0: i32) -> (i32, i32) {
    %c0_i32 = arith.constant 0 : i32
    %c0_i32_0 = arith.constant 0 : i32
    %c0_i32_1 = arith.constant 0 : i32
    return %c0_i32, %c0_i32_0 : i32, i32
  }
  func.func @transform_6(%arg0: i32) -> (i32, i32) {
    %c0_i32 = arith.constant 0 : i32
    %c0_i32_0 = arith.constant 0 : i32
    %c0_i32_1 = arith.constant 0 : i32
    return %c0_i32, %c0_i32_0 : i32, i32
  }
  func.func @transform_7(%arg0: i32) -> (i32, i32) {
    %c0_i32 = arith.constant 0 : i32
    %c0_i32_0 = arith.constant 0 : i32
    %c0_i32_1 = arith.constant 0 : i32
    return %c0_i32, %c0_i32_0 : i32, i32
  }
  func.func @transform_8(%arg0: i32) -> (i32, i32) {
    %c0_i32 = arith.constant 0 : i32
    %c0_i32_0 = arith.constant 0 : i32
    %c0_i32_1 = arith.constant 0 : i32
    return %c0_i32, %c0_i32_0 : i32, i32
  }
  func.func @transform_9(%arg0: i32) -> (i32, i32) {
    %c0_i32 = arith.constant 0 : i32
    %c0_i32_0 = arith.constant 0 : i32
    %c0_i32_1 = arith.constant 0 : i32
    return %c0_i32, %c0_i32_0 : i32, i32
  }
  func.func @transform_10(%arg0: i32) -> (i32, i32) {
    %c0_i32 = arith.constant 0 : i32
    %c0_i32_0 = arith.constant 0 : i32
    %c0_i32_1 = arith.constant 0 : i32
    return %c0_i32, %c0_i32_0 : i32, i32
  }
  func.func @transform_11(%arg0: i32) -> (i32, i32) {
    %c0_i32 = arith.constant 0 : i32
    %c0_i32_0 = arith.constant 0 : i32
    %c0_i32_1 = arith.constant 0 : i32
    return %c0_i32, %c0_i32_0 : i32, i32
  }
  func.func @transform_12(%arg0: i32) -> (i32, i32) {
    %c0_i32 = arith.constant 0 : i32
    %c0_i32_0 = arith.constant 0 : i32
    %c0_i32_1 = arith.constant 0 : i32
    return %c0_i32, %c0_i32_0 : i32, i32
  }
  func.func @transform_13(%arg0: i32) -> (i32, i32) {
    %c0_i32 = arith.constant 0 : i32
    %c0_i32_0 = arith.constant 0 : i32
    %c0_i32_1 = arith.constant 0 : i32
    return %c0_i32, %c0_i32_0 : i32, i32
  }
  func.func @transform_14(%arg0: i32) -> (i32, i32) {
    %c0_i32 = arith.constant 0 : i32
    %c0_i32_0 = arith.constant 0 : i32
    %c0_i32_1 = arith.constant 0 : i32
    return %c0_i32, %c0_i32_0 : i32, i32
  }
  func.func @transform_15(%arg0: i32) -> (i32, i32) {
    %c0_i32 = arith.constant 0 : i32
    %c0_i32_0 = arith.constant 0 : i32
    %c0_i32_1 = arith.constant 0 : i32
    return %c0_i32, %c0_i32_0 : i32, i32
  }
  func.func @transform_16(%arg0: i32) -> (i32, i32) {
    %c0_i32 = arith.constant 0 : i32
    %c0_i32_0 = arith.constant 0 : i32
    %c0_i32_1 = arith.constant 0 : i32
    return %c0_i32, %c0_i32_0 : i32, i32
  }
  func.func @transform_17(%arg0: i32) -> (i32, i32) {
    %c0_i32 = arith.constant 0 : i32
    %c0_i32_0 = arith.constant 0 : i32
    return %c0_i32, %arg0 : i32, i32
  }
}

</mosaic_0001>

<bundles_post_ra>
// kernel: tpu_custom_call.1
= control target key start
LH: loop header
LB: loop body
LE: loop exit
PB: predicated region body
PF: predicated region fallthrough
CT: control target
= control target key end

     0   :  { %s779_s0 = inlined_call_operand.vmem [shape: f32[32,128], index: 0, kind: input, shape index: {}]   ;;  %s780_s1 = inlined_call_operand.vmem [shape: f32[16,32], index: 1, kind: input, shape index: {}]   ;;  %s781_s2 = inlined_call_operand.vmem [shape: f32[16,1], index: 2, kind: input, shape index: {}]   ;;  %s782_s3 = inlined_call_operand.vmem [shape: f32[8,16], index: 3, kind: input, shape index: {}]   ;;  %s783_s4 = inlined_call_operand.vmem [shape: f32[8,1], index: 4, kind: input, shape index: {}]   ;;  %s784_s5 = inlined_call_operand.vmem [shape: f32[16,8], index: 5, kind: input, shape index: {}]   ;;  %s785_s6 = inlined_call_operand.vmem [shape: f32[16,1], index: 6, kind: input, shape index: {}]   ;;  %s786_s7 = inlined_call_operand.vmem [shape: f32[32,16], index: 7, kind: input, shape index: {}]   ;;  %s787_s8 = inlined_call_operand.vmem [shape: f32[32,1], index: 8, kind: input, shape index: {}]   ;;  %s788_s9 = inlined_call_operand.vmem [shape: f32[16,32], index: 9, kind: input, shape index: {}]   ;;  %s789_s10 = inlined_call_operand.vmem [shape: f32[16,1], index: 10, kind: input, shape index: {}]   ;;  %s790_s11 = inlined_call_operand.vmem [shape: f32[8,16], index: 11, kind: input, shape index: {}]   ;;  %s791_s12 = inlined_call_operand.vmem [shape: f32[8,1], index: 12, kind: input, shape index: {}]   ;;  %s792_s13 = inlined_call_operand.vmem [shape: f32[16,8], index: 13, kind: input, shape index: {}]   ;;  %s793_s14 = inlined_call_operand.vmem [shape: f32[16,1], index: 14, kind: input, shape index: {}]   ;;  %s794_s15 = inlined_call_operand.vmem [shape: f32[32,16], index: 15, kind: input, shape index: {}]   ;;  %s795_s16 = inlined_call_operand.vmem [shape: f32[32,1], index: 16, kind: input, shape index: {}]   ;;  %s796_s17 = inlined_call_operand.hbm [shape: f32[32,128], index: 17, kind: output, shape index: {}]  }
   0x1   :  { %799 = sst [smem:[#allocation5_spill]] %s779_s0 }
   0x2   :  { %800 = sst [smem:[#allocation6_spill]] %s780_s1 }
   0x3   :  { %s801_s26 = sld [smem:[#allocation5_spill]]  ;;  %v80_v1 = vld [vmem:[%s781_s2 + $0x8] sm:$0xff]  ;;  %v524_v3 = vmov 0  }
   0x4   :  { %495 = vset.pattern.permute.xlu0 %v524_v3  ;;  %496 = vset.pattern.permute.xlu1 %v524_v3 }
   0x5   :  { %104 = vperm.xlu0 %495, %v80_v1   ;;  %497 = vset.pattern.permute.xlu2 %v524_v3 }
   0x9   :  { %v621_v0 = vld [vmem:[%s801_s26 + $0x18] sm:$0xff]  ;;  %v629_v2 = vld [vmem:[%s801_s26 + $0x10] sm:$0xff]  ;;  %v635_v4 = vld [vmem:[%s801_s26 + $0x8] sm:$0xff] }
   0xa   :  { %126 = vmatpush.msra.mxu0 %v621_v0  ;;  %v641_v5 = vld [vmem:[%s801_s26] sm:$0xff] }
   0xc   :  { %127 = vmatpush.msra.mxu0 %v629_v2 }
   0xd   :  { %22 = vsyncpa [#allocation3], 0  ;;  %s802_s22 = sld [smem:[#allocation6_spill]]  ;;  %vm107_vm0 = vcmask 261120   ;;  %v79_v7 = vld [vmem:[%s781_s2] sm:$0xff]  ;;  %v86_v9 = vld [vmem:[%s787_s8 + $0x10] sm:$0xff] }
   0xe   :  { %128 = vmatpush.msra.mxu0 %v635_v4  ;;  %99 = vperm.xlu0 %495, %v79_v7   ;;  %v89_v10 = vld [vmem:[%s789_s10 + $0x8] sm:$0xff]  ;;  %v81_v13 = vld [vmem:[%s783_s4] sm:$0xff]  ;;  %v95_v18 = vld [vmem:[%s795_s16 + $0x10] sm:$0xff]  ;;  %vm144_vm1 = vcmask 130048   ;;  %vm178_vm2 = vcmask 64512   ;;  %s526_s26 = smov 128  }
   0xf   :  { %v92_v11 = vld [vmem:[%s793_s14 + $0x8] sm:$0xff]  ;;  %141 = vperm.xlu1 %496, %v81_v13   ;;  %v88_v16 = vld [vmem:[%s789_s10] sm:$0xff]  ;;  %v87_v29 = vld [vmem:[%s787_s8 + $0x18] sm:$0xff]  ;;  %s527_s27 = smov 8  }
  0x10   :  { %129 = vmatpush.msra.mxu0 %v641_v5  ;;  %v94_v12 = vld [vmem:[%s795_s16 + $0x8] sm:$0xff]  ;;  %v91_v17 = vld [vmem:[%s793_s14] sm:$0xff]  ;;  %v96_v38 = vld [vmem:[%s795_s16 + $0x18] sm:$0xff] }
  0x11   :  { %v83_v14 = vld [vmem:[%s785_s6 + $0x8] sm:$0xff]  ;;  %v63_v27 = vld [vmem:[%s782_s3] sm:$0xff]  ;;  %v68_v49 = vld [vmem:[%s786_s7 + $0x10] sm:$0xff] }
  0x12   :  { %v85_v15 = vld [vmem:[%s787_s8 + $0x8] sm:$0xff]  ;;  %v82_v28 = vld [vmem:[%s785_s6] sm:$0xff]  ;;  %v69_v50 = vld [vmem:[%s786_s7 + $0x18] sm:$0xff] }
  0x13   :  { %v61_v6 = vld [vmem:[%s802_s22] sm:$0xff]  ;;  %v62_v8 = vld [vmem:[%s802_s22 + $0x8] sm:$0xff]  ;;  %170 = vperm.xlu2 %497, %v82_v28  }
  0x14   :  { %472 = vmatmul.msk.f32.vlgmr.msra.gmra.mxu0 %vm107_vm0, %v61_v6  ;;  %v84_v30 = vld [vmem:[%s787_s8] sm:$0xff]  ;;  %v65_v35 = vld [vmem:[%s784_s5 + $0x8] sm:$0xff]  ;;  %s525_s8 = smov [#allocation2]  }
  0x15   :  { %v90_v31 = vld [vmem:[%s791_s12] sm:$0xff]  ;;  %v67_v48 = vld [vmem:[%s786_s7 + $0x8] sm:$0xff]  ;;  %s458_s12 = sshll.u32 %s525_s8, 4  ;;  %s459_s12 = int_to_ptr.vmem [resolvable:$true] %s458_s12 }
  0x16   :  { %222 = vperm.xlu0 %495, %v86_v9   ;;  %v64_v36 = vld [vmem:[%s784_s5] sm:$0xff]  ;;  %v76_v28 = vld [vmem:[%s794_s15 + $0x8] sm:$0xff]  ;;  %s460_s5 = sshll.u32 %s796_s17, 4  ;;  %s461_s5 = int_to_ptr.hbm [resolvable:$true] %s460_s5 }
  0x17   :  { %175 = vperm.xlu1 %496, %v83_v14   ;;  %v93_v37 = vld [vmem:[%s795_s16] sm:$0xff] }
  0x18   :  { %v66_v47 = vld [vmem:[%s786_s7] sm:$0xff] }
  0x19   :  { %v70_v7 = vld [vmem:[%s788_s9] sm:$0xff] }
  0x1a   :  { %v72_v13 = vld [vmem:[%s790_s11] sm:$0xff] }
  0x1b   :  { %227 = vperm.xlu2 %497, %v87_v29   ;;  %v77_v29 = vld [vmem:[%s794_s15 + $0x10] sm:$0xff] }
  0x1c   :  { %473 = vmatmul.msk.f32.gmra.mxu0 %vm107_vm0, %v62_v8 }
  0x1e   :  { %282 = vperm.xlu0 %495, %v89_v10  }
  0x1f   :  { %217 = vperm.xlu1 %496, %v85_v15  }
  0x23   :  { %212 = vperm.xlu2 %497, %v84_v30   ;;  %v78_v30 = vld [vmem:[%s794_s15 + $0x18] sm:$0xff] }
  0x26   :  { %351 = vperm.xlu0 %495, %v92_v11  }
  0x27   :  { %277 = vperm.xlu1 %496, %v88_v16  }
  0x2b   :  { %318 = vperm.xlu2 %497, %v90_v31  }
  0x2e   :  { %392 = vperm.xlu0 %495, %v94_v12  }
  0x2f   :  { %346 = vperm.xlu1 %496, %v91_v17   ;;  %v73_v17 = vld [vmem:[%s792_s13] sm:$0xff] }
  0x33   :  { %387 = vperm.xlu2 %497, %v93_v37  }
  0x37   :  { %397 = vperm.xlu1 %496, %v95_v18   ;;  %v74_v18 = vld [vmem:[%s792_s13 + $0x8] sm:$0xff] }
  0x3b   :  { %402 = vperm.xlu2 %497, %v96_v38  }
  0x6d   :  { %v171_v40 = vpop.permute.xlu2 %170 }
  0x75   :  { %v228_v54 = vpop.permute.xlu2 %227 }
  0x77   :  { %v105_v19 = vpop.permute.xlu0 %104 }
  0x7d   :  { %v213_v62 = vpop.permute.xlu2 %212 }
  0x80   :  { %v100_v21 = vpop.permute.xlu0 %99 }
  0x81   :  { %v142_v32 = vpop.permute.xlu1 %141 }
  0x85   :  { %v319_v14 = vpop.permute.xlu2 %318 }
  0x88   :  { %v223_v55 = vpop.permute.xlu0 %222 }
  0x89   :  { %v176_v42 = vpop.permute.xlu1 %175 }
  0x8d   :  { %v388_v31 = vpop.permute.xlu2 %387 }
  0x90   :  { %v283_v8 = vpop.permute.xlu0 %282 }
  0x91   :  { %v131_v20 = vpop.f32.mrf.mxu0  ;;  %v218_v59 = vpop.permute.xlu1 %217 }
  0x92   :  { %v132_v23 = vadd.f32 %v131_v20, %v100_v21 }
  0x94   :  { %v137_v26 = vmax.f32 %v132_v23, 0.0 }
  0x98   :  { %v352_v20 = vpop.permute.xlu0 %351 }
  0x99   :  { %v134_v22 = vpop.f32.mrf.mxu0 }
  0x9a   :  { %v135_v24 = vadd.f32 %v134_v22, %v105_v19 }
  0x9c   :  { %v138_v25 = vmax.f32 %v135_v24, 0.0 }
  0x9e   :  { %162 = vmatpush.msra.mxu1 %v138_v25 }
  0xa0   :  { %163 = vmatpush.msra.mxu1 %v137_v26 }
  0xa1   :  { %474 = vmatmul.msk.f32.vlgmr.msra.gmra.mxu1 %vm144_vm1, %v63_v27  ;;  %v75_v27 = vld [vmem:[%s794_s15] sm:$0xff] }
 0x11e   :  { %v165_v33 = vpop.f32.mrf.mxu1 }
 0x11f   :  { %v166_v34 = vadd.f32 %v165_v33, %v142_v32 }
 0x121   :  { %200 = vmatpush.msrb.mxu1 %v166_v34  ;;  %490 = vmatpush.msra.mxu3 %v166_v34 }
 0x122   :  { %476 = vmatmul.msk.f32.vlgmr.msra.gmra.mxu3 %vm178_vm2, %v65_v35  ;;  %475 = vmatmul.msk.f32.vlgmr.msrb.gmra.mxu1 %vm178_vm2, %v64_v36  ;;  %v393_v35 = vpop.permute.xlu0 %392 }
 0x19f   :  { %v202_v39 = vpop.f32.mrf.mxu1 }
 0x1a0   :  { %v203_v41 = vadd.f32 %v202_v39, %v171_v40 }
 0x1a2   :  { %v208_v46 = vmax.f32 %v203_v41, 0.0 }
 0x1a5   :  { %v205_v43 = vpop.f32.mrf.mxu3 }
 0x1a6   :  { %v206_v44 = vadd.f32 %v205_v43, %v176_v42  ;;  %v403_v43 = vpop.permute.xlu2 %402 }
 0x1a8   :  { %v209_v45 = vmax.f32 %v206_v44, 0.0 }
 0x1aa   :  { %256 = vmatpush.msrb.mxu3 %v209_v45 }
 0x1ac   :  { %257 = vmatpush.msrb.mxu3 %v208_v46 }
 0x1ad   :  { %477 = vmatmul.msk.f32.vlgmr.msrb.gmra.mxu3 %vm144_vm1, %v66_v47 }
 0x1b5   :  { %478 = vmatmul.msk.f32.gmra.mxu3 %vm144_vm1, %v67_v48 }
 0x1bd   :  { %479 = vmatmul.msk.f32.gmra.mxu3 %vm144_vm1, %v68_v49 }
 0x1c5   :  { %480 = vmatmul.msk.f32.gmra.mxu3 %vm144_vm1, %v69_v50 }
 0x230   :  { %v259_v51 = vpop.f32.mrf.mxu3 }
 0x231   :  { %v260_v63 = vadd.f32 %v259_v51, %v213_v62 }
 0x233   :  { %v271_v6 = vadd.f32 %v260_v63, %v641_v5 }
 0x238   :  { %v262_v52 = vpop.f32.mrf.mxu3 }
 0x239   :  { %v263_v60 = vadd.f32 %v262_v52, %v218_v59 }
 0x23b   :  { %v272_v3 = vadd.f32 %v263_v60, %v635_v4  ;;  %v278_v4 = vpop.permute.xlu1 %277 }
 0x240   :  { %v265_v53 = vpop.f32.mrf.mxu3 }
 0x241   :  { %v266_v57 = vadd.f32 %v265_v53, %v223_v55 }
 0x243   :  { %v273_v1 = vadd.f32 %v266_v57, %v629_v2  ;;  %v347_v21 = vpop.permute.xlu1 %346 }
 0x248   :  { %v268_v56 = vpop.f32.mrf.mxu3 }
 0x249   :  { %v269_v58 = vadd.f32 %v268_v56, %v228_v54 }
 0x24b   :  { %v733_v61 = vadd.f32 %v269_v58, %v621_v0  ;;  %v71_v0 = vld [vmem:[%s788_s9 + $0x8] sm:$0xff]  ;;  %v398_v39 = vpop.permute.xlu1 %397 }
 0x24d   :  { %303 = vmatpush.msra.mxu1 %v733_v61 }
 0x24f   :  { %304 = vmatpush.msra.mxu1 %v273_v1 }
 0x251   :  { %305 = vmatpush.msra.mxu1 %v272_v3 }
 0x253   :  { %306 = vmatpush.msra.mxu1 %v271_v6 }
 0x254   :  { %481 = vmatmul.msk.f32.vlgmr.msra.gmra.mxu1 %vm107_vm0, %v70_v7 }
 0x25c   :  { %482 = vmatmul.msk.f32.gmra.mxu1 %vm107_vm0, %v71_v0 }
 0x2d1   :  { %v308_v2 = vpop.f32.mrf.mxu1 }
 0x2d2   :  { %v309_v10 = vadd.f32 %v308_v2, %v278_v4 }
 0x2d4   :  { %v314_v12 = vmax.f32 %v309_v10, 0.0 }
 0x2d9   :  { %v311_v9 = vpop.f32.mrf.mxu1 }
 0x2da   :  { %v312_v5 = vadd.f32 %v311_v9, %v283_v8 }
 0x2dc   :  { %v315_v11 = vmax.f32 %v312_v5, 0.0 }
 0x2de   :  { %338 = vmatpush.msra.mxu2 %v315_v11 }
 0x2e0   :  { %339 = vmatpush.msra.mxu2 %v314_v12 }
 0x2e1   :  { %483 = vmatmul.msk.f32.vlgmr.msra.gmra.mxu2 %vm144_vm1, %v72_v13 }
 0x364   :  { %v341_v15 = vpop.f32.mrf.mxu2 }
 0x365   :  { %v342_v16 = vadd.f32 %v341_v15, %v319_v14 }
 0x367   :  { %375 = vmatpush.msrb.mxu0 %v342_v16 }
 0x368   :  { %484 = vmatmul.msk.f32.vlgmr.msrb.gmra.mxu0 %vm178_vm2, %v73_v17 }
 0x370   :  { %485 = vmatmul.msk.f32.gmra.mxu0 %vm178_vm2, %v74_v18 }
 0x3e5   :  { %v377_v19 = vpop.f32.mrf.mxu0 }
 0x3e6   :  { %v378_v23 = vadd.f32 %v377_v19, %v347_v21 }
 0x3e8   :  { %v383_v26 = vmax.f32 %v378_v23, 0.0 }
 0x3ed   :  { %v380_v22 = vpop.f32.mrf.mxu0 }
 0x3ee   :  { %v381_v24 = vadd.f32 %v380_v22, %v352_v20 }
 0x3f0   :  { %v384_v25 = vmax.f32 %v381_v24, 0.0 }
 0x3f2   :  { %431 = vmatpush.msrb.mxu2 %v384_v25 }
 0x3f4   :  { %432 = vmatpush.msrb.mxu2 %v383_v26 }
 0x3f5   :  { %486 = vmatmul.msk.f32.vlgmr.msrb.gmra.mxu2 %vm144_vm1, %v75_v27 }
 0x3fd   :  { %487 = vmatmul.msk.f32.gmra.mxu2 %vm144_vm1, %v76_v28 }
 0x405   :  { %488 = vmatmul.msk.f32.gmra.mxu2 %vm144_vm1, %v77_v29 }
 0x40d   :  { %489 = vmatmul.msk.f32.gmra.mxu2 %vm144_vm1, %v78_v30 }
 0x478   :  { %v434_v32 = vpop.f32.mrf.mxu2 }
 0x479   :  { %v435_v33 = vadd.f32 %v434_v32, %v388_v31 }
 0x47b   :  { %v446_v34 = vadd.f32 %v435_v33, %v271_v6 }
 0x47d   :  { %450 = vst [vmem:[#allocation2] sm:$0xff] %v446_v34 }
 0x480   :  { %v437_v36 = vpop.f32.mrf.mxu2 }
 0x481   :  { %v438_v37 = vadd.f32 %v437_v36, %v393_v35 }
 0x483   :  { %v447_v38 = vadd.f32 %v438_v37, %v272_v3 }
 0x485   :  { %451 = vst [vmem:[#allocation2 + $0x8] sm:$0xff] %v447_v38 }
 0x488   :  { %v440_v40 = vpop.f32.mrf.mxu2 }
 0x489   :  { %v441_v41 = vadd.f32 %v440_v40, %v398_v39 }
 0x48b   :  { %v448_v42 = vadd.f32 %v441_v41, %v273_v1 }
 0x48d   :  { %452 = vst [vmem:[#allocation2 + $0x10] sm:$0xff] %v448_v42 }
 0x490   :  { %v443_v44 = vpop.f32.mrf.mxu2 }
 0x491   :  { %v444_v45 = vadd.f32 %v443_v44, %v403_v43 }
 0x493   :  { %v449_v46 = vadd.f32 %v444_v45, %v733_v61 }
 0x495   :  { %453 = vst [vmem:[#allocation2 + $0x18] sm:$0xff] %v449_v46 }
 0x496   :  { %466 = dma.vmem_to_hbm [thread:$0]  %s459_s12, 512, %s461_s5, [#allocation3], %s526_s26, %s526_s26, %s527_s27  }
 0x497   :  { %522 = dma.done.wait [#allocation3], 512  }
 0x498   :  { %523 = vsyncadd [#allocation3], 4294966784 }
 0x499   :  { %471 = vsyncpa [#allocation3], 1 }

</bundles_post_ra>
